<compile_context>
chip_gen: v6e
topology: v6e:2x2x1
jax: 0.10.0
libtpu: 0.0.40
codegen_flags: <defaults>
</compile_context>

<pallas_src>
import jax
import jax.numpy as jnp
from jax.experimental import pallas as pl
from jax.experimental.pallas import tpu as pltpu


def _round_up(x, m):
    return ((x + m - 1) // m) * m


def _cdiv(a, b):
    return (a + b - 1) // b


def _attention_kernel(h_ref, m_ref, w_ref, b_ref, out_ref, attn_ref):
    """One grid step processes `bb` batch elements.

    h_ref    : [bb*S, H]   flattened hidden rows for this batch tile
    m_ref    : [bb, S, 1]  float mask (1 = valid, 0 = padding)
    w_ref    : [H, Hp]     augmented weight (col 0 = W@query, cols 1..H = W)
    b_ref    : [1, Hp]     augmented bias   (col 0 = bias@query, cols 1..H = bias)
    out_ref  : [bb, Hp]    lane-dense output slab (cols 1..H = batch_outputs)
    attn_ref : [bb, S, 1]  softmax attention scores
    """
    bb, S, _ = m_ref.shape
    Hp = w_ref.shape[1]

    # One MXU matmul yields both key (cols 1..H) and the attention logits (col 0).
    key_aug = jnp.dot(h_ref[...], w_ref[...],
                      preferred_element_type=jnp.float32) + b_ref[...]
    key3 = key_aug.reshape(bb, S, Hp)                     # [bb, S, Hp]

    valid = m_ref[...] > 0.5                              # [bb, S, 1]
    scores = key3[:, :, :1]                               # [bb, S, 1] logits
    masked = jnp.where(valid, scores, jnp.float32(-1e32))

    # Softmax over the sequence axis (axis=1), independently per batch element.
    m_max = jnp.max(masked, axis=1, keepdims=True)        # [bb, 1, 1]
    e = jnp.exp(masked - m_max)                           # EUP
    denom = jnp.sum(e, axis=1, keepdims=True)             # [bb, 1, 1]
    attn = e * pl.reciprocal(denom, approx=True)          # divide -> EUP recip
    attn_ref[...] = attn

    attn_m = jnp.where(valid, attn, jnp.float32(0.0))     # [bb, S, 1]
    # Weighted sum over the sequence axis; full-width lane-dense store.
    out_ref[...] = jnp.sum(attn_m * key3, axis=1)         # [bb, Hp]


def _choose_block_b(B, S, H, Hp):
    """Batch-tile size: as large as fits a ~6 MB/step VMEM budget, <= 512,
    ~2048 hidden rows per step, multiple of 8, padding-minimizing."""
    if B <= 8:
        return B
    # Dominant per-step VMEM: hidden in (x2 buf), key_aug temp, mask/out/attn.
    bytes_per_batch = 4 * S * (2 * H + Hp + 8) + 4 * 3 * Hp
    budget = 6 * 1024 * 1024
    bb = min(budget // max(bytes_per_batch, 1), max(1, 2048 // max(S, 1)), 512)
    bb = max(8, (bb // 8) * 8)
    if bb >= B:
        return B
    # Rebalance tiles so batch padding is minimal for the same tile count.
    ntiles = _cdiv(B, bb)
    bb = _round_up(_cdiv(B, ntiles), 8)
    return bb


@jax.jit
def attention_forward(batch_hidden, batch_masks, weight, bias, query):
    """Pallas TPU forward of the PyTorch Attention module.

    batch_hidden: [B, S, H] float, batch_masks: [B, S] (1 valid / 0 pad).
    Returns (batch_outputs [B, H], attn_scores [B, S]).
    """
    batch_hidden = batch_hidden.astype(jnp.float32)
    batch_masks = batch_masks.astype(jnp.float32)
    weight = weight.astype(jnp.float32)
    bias = bias.astype(jnp.float32)
    query = query.astype(jnp.float32)

    B, S, H = batch_hidden.shape
    Hp = _round_up(H + 1, 128)            # lane-dense matmul N / output width

    # Fold the query reduction into the MXU matmul.
    wq = jnp.dot(weight, query)           # [H]
    bq = jnp.dot(bias, query)             # scalar
    w_aug = jnp.concatenate(
        [wq[:, None], weight, jnp.zeros((H, Hp - H - 1), jnp.float32)], axis=1)
    b_aug = jnp.concatenate(
        [bq[None], bias, jnp.zeros((Hp - H - 1,), jnp.float32)])[None, :]

    # Batch tiling (many batch elements per grid step); pad B to a tile multiple.
    bb = _choose_block_b(B, S, H, Hp)
    B_pad = _round_up(B, bb)
    if B_pad != B:
        pad = B_pad - B
        batch_hidden = jnp.pad(batch_hidden, ((0, pad), (0, 0), (0, 0)))
        batch_masks = jnp.pad(batch_masks, ((0, pad), (0, 0)))

    hidden2 = batch_hidden.reshape(B_pad * S, H)
    mask3 = batch_masks.reshape(B_pad, S, 1)

    grid = (B_pad // bb,)
    flops = 2 * B_pad * S * H * Hp + 8 * B_pad * S * Hp
    bytes_accessed = 4 * (B_pad * S * H + B_pad * S + H * Hp + Hp
                          + B_pad * Hp + B_pad * S)

    out_aug, attn3 = pl.pallas_call(
        _attention_kernel,
        out_shape=(
            jax.ShapeDtypeStruct((B_pad, Hp), jnp.float32),
            jax.ShapeDtypeStruct((B_pad, S, 1), jnp.float32),
        ),
        grid_spec=pltpu.PrefetchScalarGridSpec(
            num_scalar_prefetch=0,
            grid=grid,
            in_specs=[
                pl.BlockSpec((bb * S, H), lambda i: (i, 0)),     # hidden rows
                pl.BlockSpec((bb, S, 1), lambda i: (i, 0, 0)),   # mask
                pl.BlockSpec((H, Hp), lambda i: (0, 0)),         # augmented weight
                pl.BlockSpec((1, Hp), lambda i: (0, 0)),         # augmented bias
            ],
            out_specs=[
                pl.BlockSpec((bb, Hp), lambda i: (i, 0)),        # lane-dense output
                pl.BlockSpec((bb, S, 1), lambda i: (i, 0, 0)),   # attention scores
            ],
        ),
        compiler_params=pltpu.CompilerParams(
            dimension_semantics=("parallel",),
            vmem_limit_bytes=32 * 1024 * 1024,
        ),
        cost_estimate=pl.CostEstimate(
            flops=flops,
            transcendentals=B_pad * S,
            bytes_accessed=bytes_accessed,
        ),
    )(hidden2, mask3, w_aug, b_aug)

    batch_outputs = out_aug[:B, 1:H + 1]
    attn_scores = attn3.reshape(B_pad, S)[:B]
    return batch_outputs, attn_scores


def _reference_forward(batch_hidden, batch_masks, weight, bias, query):
    key = jnp.einsum("bsh,hk->bsk", batch_hidden, weight) + bias
    outputs = jnp.einsum("bsh,h->bs", key, query)
    valid = batch_masks > 0.5
    masked = jnp.where(valid, outputs, -1e32)
    attn = jax.nn.softmax(masked, axis=1)
    attn_m = jnp.where(valid, attn, 0.0)
    out = jnp.einsum("bs,bsh->bh", attn_m, key)
    return out, attn


if __name__ == "__main__":
    B, S, H = 2, 8, 32

    key0 = jax.random.PRNGKey(0)
    k_h, k_w, k_q = jax.random.split(key0, 3)

    batch_hidden = jax.random.normal(k_h, (B, S, H), dtype=jnp.float32)
    lengths = jnp.array([6, 5], dtype=jnp.int32)
    batch_masks = (jnp.arange(S)[None, :] < lengths[:, None]).astype(jnp.float32)

    weight = 0.05 * jax.random.normal(k_w, (H, H), dtype=jnp.float32)
    bias = jnp.zeros((H,), dtype=jnp.float32)
    query = 0.05 * jax.random.normal(k_q, (H,), dtype=jnp.float32)

    out, attn = attention_forward(batch_hidden, batch_masks, weight, bias, query)
    out, attn = jax.block_until_ready((out, attn))

    ref_out, ref_attn = _reference_forward(batch_hidden, batch_masks,
                                           weight, bias, query)
    assert out.shape == (B, H) and attn.shape == (B, S)
    assert jnp.allclose(out, ref_out, atol=2e-3, rtol=2e-3)
    assert jnp.allclose(attn, ref_attn, atol=2e-3, rtol=2e-3)

    # Exercise the multi-tile / padded-batch path (grid > 1) with nonzero bias
    # and some fully-masked rows.
    B2 = 300
    k_h2, k_b2 = jax.random.split(jax.random.PRNGKey(1), 2)
    hidden_big = jax.random.normal(k_h2, (B2, S, H), dtype=jnp.float32)
    lens_big = jnp.arange(B2, dtype=jnp.int32) % (S + 1)
    masks_big = (jnp.arange(S)[None, :] < lens_big[:, None]).astype(jnp.float32)
    bias_big = 0.05 * jax.random.normal(k_b2, (H,), dtype=jnp.float32)

    out2, attn2 = attention_forward(hidden_big, masks_big, weight, bias_big, query)
    out2, attn2 = jax.block_until_ready((out2, attn2))
    ref_out2, ref_attn2 = _reference_forward(hidden_big, masks_big,
                                             weight, bias_big, query)
    assert jnp.allclose(out2, ref_out2, atol=2e-3, rtol=2e-3)
    assert jnp.allclose(attn2, ref_attn2, atol=2e-3, rtol=2e-3)

    print("KERNEL_OK")
</pallas_src>

<mosaic_0001>
module attributes {stable_mosaic.version = 11 : i64} {
  func.func @_attention_kernel(%arg0: i32, %arg1: memref<16x32xf32, #tpu.memory_space<vmem>>, %arg2: memref<2x8x1xf32, #tpu.memory_space<vmem>>, %arg3: memref<32x128xf32, #tpu.memory_space<vmem>>, %arg4: memref<1x128xf32, #tpu.memory_space<vmem>>, %arg5: memref<2x128xf32, #tpu.memory_space<vmem>>, %arg6: memref<2x8x1xf32, #tpu.memory_space<vmem>>) attributes {dimension_semantics = [#tpu.dimension_semantics<parallel>], iteration_bounds = array<i64: 1>, scalar_prefetch = 0 : i64, scratch_operands = 0 : i64, tpu.core_type = #tpu.core_type<tc>, window_params = [{transform_indices = @transform_0, window_bounds = array<i64: 16, 32>}, {transform_indices = @transform_1, window_bounds = array<i64: 2, 8, 1>}, {pipeline_mode = #tpu.pipeline_mode<synchronous>, transform_indices = @transform_2, window_bounds = array<i64: 32, 128>}, {pipeline_mode = #tpu.pipeline_mode<synchronous>, transform_indices = @transform_3, window_bounds = array<i64: 1, 128>}, {transform_indices = @transform_4, window_bounds = array<i64: 2, 128>}, {transform_indices = @transform_5, window_bounds = array<i64: 2, 8, 1>}]} {
    %c0 = arith.constant 0 : index
    %c0_0 = arith.constant 0 : index
    %0 = vector.load %arg1[%c0, %c0_0] : memref<16x32xf32, #tpu.memory_space<vmem>>, vector<16x32xf32>
    %c0_1 = arith.constant 0 : index
    %c0_2 = arith.constant 0 : index
    %1 = vector.load %arg3[%c0_1, %c0_2] : memref<32x128xf32, #tpu.memory_space<vmem>>, vector<32x128xf32>
    %cst = arith.constant dense<0.000000e+00> : vector<16x128xf32>
    %2 = tpu.matmul %0, %1, %cst {dimension_numbers = #tpu.dot_dimension_numbers<[1], [0], [0], [1], [0, 0, 1, 1], [], []>} : vector<16x32xf32>, vector<32x128xf32>, vector<16x128xf32> -> vector<16x128xf32>
    %c0_3 = arith.constant 0 : index
    %c0_4 = arith.constant 0 : index
    %3 = vector.load %arg4[%c0_3, %c0_4] : memref<1x128xf32, #tpu.memory_space<vmem>>, vector<1x128xf32>
    %4 = vector.broadcast %3 : vector<1x128xf32> to vector<16x128xf32>
    %5 = arith.addf %2, %4 : vector<16x128xf32>
    %6 = vector.shape_cast %5 : vector<16x128xf32> to vector<2x8x128xf32>
    %c0_5 = arith.constant 0 : index
    %c0_6 = arith.constant 0 : index
    %c0_7 = arith.constant 0 : index
    %7 = vector.load %arg2[%c0_5, %c0_6, %c0_7] : memref<2x8x1xf32, #tpu.memory_space<vmem>>, vector<2x8x1xf32>
    %cst_8 = arith.constant 5.000000e-01 : f32
    %8 = vector.broadcast %cst_8 : f32 to vector<2x8x1xf32>
    %9 = arith.cmpf ogt, %7, %8 : vector<2x8x1xf32>
    %10 = vector.extract_strided_slice %6 {offsets = [0, 0, 0], sizes = [2, 8, 1], strides = [1, 1, 1]} : vector<2x8x128xf32> to vector<2x8x1xf32>
    %cst_9 = arith.constant -1.000000e+32 : f32
    %11 = vector.broadcast %cst_9 : f32 to vector<2x8x1xf32>
    %12 = arith.select %9, %10, %11 : vector<2x8x1xi1>, vector<2x8x1xf32>
    %cst_10 = arith.constant dense<0xFF800000> : vector<2x1xf32>
    %13 = vector.multi_reduction <maximumf>, %12, %cst_10 [1] : vector<2x8x1xf32> to vector<2x1xf32>
    %14 = vector.shape_cast %13 : vector<2x1xf32> to vector<2x1x1xf32>
    %15 = vector.broadcast %14 : vector<2x1x1xf32> to vector<2x8x1xf32>
    %16 = arith.subf %12, %15 : vector<2x8x1xf32>
    %17 = math.exp %16 : vector<2x8x1xf32>
    %cst_11 = arith.constant dense<0.000000e+00> : vector<2x1xf32>
    %18 = vector.multi_reduction <add>, %17, %cst_11 [1] : vector<2x8x1xf32> to vector<2x1xf32>
    %19 = vector.shape_cast %18 : vector<2x1xf32> to vector<2x1x1xf32>
    %20 = tpu.reciprocal %19 {approx = true} : vector<2x1x1xf32> -> vector<2x1x1xf32>
    %21 = vector.broadcast %20 : vector<2x1x1xf32> to vector<2x8x1xf32>
    %22 = arith.mulf %17, %21 : vector<2x8x1xf32>
    %c0_12 = arith.constant 0 : index
    %c0_13 = arith.constant 0 : index
    %c0_14 = arith.constant 0 : index
    %23 = vector.load %arg6[%c0_12, %c0_13, %c0_14] : memref<2x8x1xf32, #tpu.memory_space<vmem>>, vector<2x8x1xf32>
    tpu.vector_store %arg6[%c0_12, %c0_13, %c0_14], %22 {strides = array<i32>} : memref<2x8x1xf32, #tpu.memory_space<vmem>>, vector<2x8x1xf32>,
    %cst_15 = arith.constant 0.000000e+00 : f32
    %24 = vector.broadcast %cst_15 : f32 to vector<2x8x1xf32>
    %25 = arith.select %9, %22, %24 : vector<2x8x1xi1>, vector<2x8x1xf32>
    %26 = vector.broadcast %25 : vector<2x8x1xf32> to vector<2x8x128xf32>
    %27 = arith.mulf %26, %6 : vector<2x8x128xf32>
    %cst_16 = arith.constant dense<0.000000e+00> : vector<2x128xf32>
    %28 = vector.multi_reduction <add>, %27, %cst_16 [1] : vector<2x8x128xf32> to vector<2x128xf32>
    %c0_17 = arith.constant 0 : index
    %c0_18 = arith.constant 0 : index
    %29 = vector.load %arg5[%c0_17, %c0_18] : memref<2x128xf32, #tpu.memory_space<vmem>>, vector<2x128xf32>
    tpu.vector_store %arg5[%c0_17, %c0_18], %28 {strides = array<i32>} : memref<2x128xf32, #tpu.memory_space<vmem>>, vector<2x128xf32>,
    return
  }
  func.func @transform_0(%arg0: i32) -> (i32, i32) {
    %c0_i32 = arith.constant 0 : i32
    %c0_i32_0 = arith.constant 0 : i32
    return %arg0, %c0_i32 : i32, i32
  }
  func.func @transform_1(%arg0: i32) -> (i32, i32, i32) {
    %c0_i32 = arith.constant 0 : i32
    %c0_i32_0 = arith.constant 0 : i32
    %c0_i32_1 = arith.constant 0 : i32
    return %arg0, %c0_i32, %c0_i32_0 : i32, i32, i32
  }
  func.func @transform_2(%arg0: i32) -> (i32, i32) {
    %c0_i32 = arith.constant 0 : i32
    %c0_i32_0 = arith.constant 0 : i32
    %c0_i32_1 = arith.constant 0 : i32
    return %c0_i32, %c0_i32_0 : i32, i32
  }
  func.func @transform_3(%arg0: i32) -> (i32, i32) {
    %c0_i32 = arith.constant 0 : i32
    %c0_i32_0 = arith.constant 0 : i32
    %c0_i32_1 = arith.constant 0 : i32
    return %c0_i32, %c0_i32_0 : i32, i32
  }
  func.func @transform_4(%arg0: i32) -> (i32, i32) {
    %c0_i32 = arith.constant 0 : i32
    %c0_i32_0 = arith.constant 0 : i32
    return %arg0, %c0_i32 : i32, i32
  }
  func.func @transform_5(%arg0: i32) -> (i32, i32, i32) {
    %c0_i32 = arith.constant 0 : i32
    %c0_i32_0 = arith.constant 0 : i32
    %c0_i32_1 = arith.constant 0 : i32
    return %arg0, %c0_i32, %c0_i32_0 : i32, i32, i32
  }
}

</mosaic_0001>

<bundles_post_ra>
// kernel: attention_forward.1
= control target key start
LH: loop header
LB: loop body
LE: loop exit
PB: predicated region body
PF: predicated region fallthrough
CT: control target
= control target key end

     0   :  { %vm32_vm0 = vcmask 261120   ;;  %v231_v6 = vmov 0   ;;  %vm120_vm2 = vcmask 7168   ;;  %vm189_vm4 = vcmask 1041409   ;;  %s310_s2 = inlined_call_operand.vmem [shape: f32[32,128], index: 2, kind: input, shape index: {}]   ;;  %s311_s0 = inlined_call_operand.vmem [shape: f32[16,32], index: 0, kind: input, shape index: {}]   ;;  %s312_s1 = inlined_call_operand.vmem [shape: f32[2,8,1], index: 1, kind: input, shape index: {}]   ;;  %s313_s3 = inlined_call_operand.vmem [shape: f32[1,128], index: 3, kind: input, shape index: {}]   ;;  %s314_s5 = inlined_call_operand.vmem [shape: f32[2,8,1], index: 5, kind: output, shape index: {1}]   ;;  %s315_s4 = inlined_call_operand.vmem [shape: f32[2,128], index: 4, kind: output, shape index: {0}]  }
   0x1   :  { %v24_v0 = vld [vmem:[%s310_s2 + $0x18] sm:$0xff]  ;;  %v23_v1 = vld [vmem:[%s310_s2 + $0x10] sm:$0xff]  ;;  %v19_v2 = vld [vmem:[%s311_s0] sm:$0xff]  ;;  %222 = vset.pattern.permute.xlu0 %v231_v6 }
   0x2   :  { %210 = vmatprep.subr.mxu0 %v24_v0  ;;  %v22_v3 = vld [vmem:[%s310_s2 + $0x8] sm:$0xff]  ;;  %218 = vmatprep.mubr.msk.f32.mxu0 %vm32_vm0, %v19_v2  ;;  %v21_v4 = vld [vmem:[%s310_s2] sm:$0xff] }
   0x3   :  { %211 = vmatpush3.msra.mxu0 %v24_v0  ;;  %v20_v5 = vld [vmem:[%s311_s0 + $0x8] sm:$0xff]  ;;  %v201_v8 = vld [vmem:[%s313_s3] ss:$0 sm:$0xff] }
   0x4   :  { %212 = vmatprep.subr.mxu0 %v23_v1  ;;  %v115_v7 = vld [vmem:[%s312_s1 + $0x8] sm:$0xff]  ;;  %v114_v9 = vld [vmem:[%s312_s1] sm:$0xff] }
   0x5   :  { %213 = vmatpush3.msra.mxu0 %v23_v1  ;;  %vm117_vm1 = vcmp.gt.f32.partialorder %v115_v7, 0.5  ;;  %vm116_vm3 = vcmp.gt.f32.partialorder %v114_v9, 0.5 }
   0x6   :  { %214 = vmatprep.subr.mxu0 %v22_v3 }
   0x7   :  { %215 = vmatpush3.msra.mxu0 %v22_v3 }
   0x8   :  { %216 = vmatprep.subr.mxu0 %v21_v4 }
   0x9   :  { %217 = vmatpush3.msra.mxu0 %v21_v4 }
   0xa   :  { %219 = vmatmul.mubr.msk.f32.vlgmr.msra.gmra.mxu0 %vm32_vm0, %v20_v5 }
  0xca   :  { %v220_v10 = vpop.f32.mrf.mxu0 }
  0xcb   :  { %v111_v11 = vadd.f32 %v220_v10, %v201_v8 }
  0xcc   :  { %v105_v12 = vpop.f32.mrf.mxu0 }
  0xcd   :  { %v119_v13 = vsel %vm117_vm1, %v111_v11, -1e+32  ;;  %v106_v14 = vadd.f32 %v201_v8, %v105_v12 }
  0xce   :  { %v128_v15 = vsel %vm120_vm2, %v119_v13, -inf }
  0xcf   :  { %v129_v16 = vrot.slane %v128_v15, 4  ;;  %v118_v17 = vsel %vm116_vm3, %v106_v14, -1e+32 }
  0xd0   :  { %v121_v18 = vsel %vm120_vm2, %v118_v17, -inf }
  0xd1   :  { %v130_v19 = vmax.f32 %v128_v15, %v129_v16  ;;  %v122_v20 = vrot.slane %v121_v18, 4 }
  0xd3   :  { %v131_v21 = vrot.slane %v130_v19, 2  ;;  %v123_v22 = vmax.f32 %v121_v18, %v122_v20 }
  0xd5   :  { %v132_v23 = vmax.f32 %v130_v19, %v131_v21  ;;  %v124_v24 = vrot.slane %v123_v22, 2 }
  0xd7   :  { %v133_v25 = vrot.slane %v132_v23, 1  ;;  %v125_v26 = vmax.f32 %v123_v22, %v124_v24 }
  0xd9   :  { %v134_v27 = vmax.f32 %v132_v23, %v133_v25  ;;  %v126_v28 = vrot.slane %v125_v26, 1 }
  0xdb   :  { %v136_v29 = vsub.f32 %v119_v13, %v134_v27  ;;  %v127_v30 = vmax.f32 %v125_v26, %v126_v28 }
  0xdd   :  { %v139_v31 = vmul.f32 1.442695, %v136_v29  ;;  %v135_v32 = vsub.f32 %v118_v17, %v127_v30 }
  0xdf   :  { %223 = vpow2.f32 %v139_v31  ;;  %v137_v33 = vmul.f32 1.442695, %v135_v32 }
  0xe1   :  { %225 = vpow2.f32 %v137_v33 }
  0xec   :  { %v224_v34 = vpop.eup %223 }
  0xed   :  { %v148_v35 = vsel %vm120_vm2, %v224_v34, 0.0 }
  0xee   :  { %v226_v36 = vpop.eup %225  ;;  %v149_v37 = vrot.slane %v148_v35, 4 }
  0xef   :  { %v141_v38 = vsel %vm120_vm2, %v226_v36, 0.0 }
  0xf0   :  { %v150_v39 = vadd.f32 %v149_v37, %v148_v35  ;;  %v142_v40 = vrot.slane %v141_v38, 4 }
  0xf2   :  { %v151_v41 = vrot.slane %v150_v39, 2  ;;  %v143_v42 = vadd.f32 %v142_v40, %v141_v38 }
  0xf4   :  { %v144_v43 = vrot.slane %v143_v42, 2  ;;  %v152_v44 = vadd.f32 %v151_v41, %v150_v39 }
  0xf6   :  { %v145_v45 = vadd.f32 %v144_v43, %v143_v42  ;;  %v153_v46 = vrot.slane %v152_v44, 1 }
  0xf8   :  { %v146_v47 = vrot.slane %v145_v45, 1  ;;  %v154_v48 = vadd.f32 %v153_v46, %v152_v44 }
  0xfa   :  { %v147_v49 = vadd.f32 %v146_v47, %v145_v45  ;;  %227 = vrcp.f32 %v154_v48 }
  0xfc   :  { %229 = vrcp.f32 %v147_v49 }
 0x107   :  { %v228_v50 = vpop.eup %227 }
 0x108   :  { %v158_v51 = vmul.f32 %v228_v50, %v224_v34 }
 0x109   :  { %v230_v52 = vpop.eup %229 }
 0x10a   :  { %v157_v53 = vmul.f32 %v230_v52, %v226_v36  ;;  %160 = vst.msk [vmem:[%s314_s5 + $0x8] sm:$0xff] %vm120_vm2, %v158_v51  ;;  %v162_v55 = vsel %vm117_vm1, %v158_v51, 0.0 }
 0x10c   :  { %v161_v54 = vsel %vm116_vm3, %v157_v53, 0.0  ;;  %159 = vst.msk [vmem:[%s314_s5] sm:$0xff] %vm120_vm2, %v157_v53 }
 0x10d   :  { %165 = vperm.xlu0 %222, %v161_v54  }
 0x111   :  { %170 = vperm.xlu0 %222, %v162_v55  }
 0x188   :  { %v166_v56 = vpop.permute.xlu0 %165 }
 0x189   :  { %v173_v57 = vmul.f32 %v166_v56, %v106_v14 }
 0x18b   :  { %v175_v58 = vrot.slane %v173_v57, 4 }
 0x18c   :  { %v171_v59 = vpop.permute.xlu0 %170 }
 0x18d   :  { %v176_v60 = vadd.f32 %v175_v58, %v173_v57  ;;  %v174_v61 = vmul.f32 %v171_v59, %v111_v11 }
 0x18f   :  { %v177_v62 = vrot.slane %v176_v60, 2  ;;  %v181_v63 = vrot.slane %v174_v61, 4 }
 0x191   :  { %v178_v0 = vadd.f32 %v177_v62, %v176_v60  ;;  %v182_v1 = vadd.f32 %v181_v63, %v174_v61 }
 0x193   :  { %v183_v2 = vrot.slane %v182_v1, 2  ;;  %v179_v3 = vrot.slane %v178_v0, 1 }
 0x195   :  { %v184_v4 = vadd.f32 %v183_v2, %v182_v1  ;;  %v180_v6 = vadd.f32 %v179_v3, %v178_v0 }
 0x197   :  { %v185_v5 = vrot.slane %v184_v4, 1 }
 0x199   :  { %v186_v8 = vadd.f32 %v185_v5, %v184_v4 }
 0x19b   :  { %v190_v7 = vsel %vm189_vm4, %v186_v8, %v180_v6 }
 0x19c   :  { %192 = vst [vmem:[%s315_s4] sm:$0x3] %v190_v7 }

</bundles_post_ra>
